<compile_context>
chip_gen: v7x
topology: tpu7x:2x2x1
jax: 0.10.0
libtpu: 0.0.40
codegen_flags: <defaults>
</compile_context>

<pallas_src>
import re
import functools

import numpy as np
import jax
import jax.numpy as jnp
from jax.experimental import pallas as pl
from jax.experimental.pallas import tpu as pltpu


# ------------------------------ Pallas kernel --------------------------------

def _affine_kernel(x_ref, m_ref, b_ref, o_ref, *, apply_sigmoid):
    """o = sigmoid(M @ x + b) on one lane tile.

    x_ref: (d_in,  TN)  activation tile (bf16 or f32), pixel blocks on lanes
    m_ref: (d_out, d_in) composed whole-network matrix, f32, VMEM-resident
    b_ref: (d_out, 1)    composed bias, f32
    o_ref: (d_out, TN)
    """
    x = x_ref[...].astype(jnp.float32)        # f32 matmul / f32 accumulation
    y = jnp.dot(m_ref[...], x, preferred_element_type=jnp.float32)
    y = y + b_ref[...]                        # (d_out, 1) broadcast over lanes
    if apply_sigmoid:
        y = jax.nn.sigmoid(y)
    o_ref[...] = y.astype(o_ref.dtype)


def _round_up(x, m):
    return (x + m - 1) // m * m


def _sublane_pad(c, dtype):
    """Rows a (c, lanes) tile physically occupies: 8 for f32, 16 for bf16."""
    sub = (8 * 4) // jnp.dtype(dtype).itemsize
    return _round_up(c, sub)


def _choose_lane_tile(n, d_in, d_out, act_dtype, *,
                      step_budget_bytes=2 << 20, min_steps=8):
    """Lane tile (multiple of 128): one (input+output) step tile stays within
    ~step_budget_bytes (sublane-padding aware) and, for large n, the grid has
    at least `min_steps` steps so BlockSpec double-buffering can overlap DMA
    with compute and the 'parallel' axis can shard across v7x's two TCs."""
    itemsize = jnp.dtype(act_dtype).itemsize
    per_lane = (_sublane_pad(d_in, act_dtype)
                + _sublane_pad(d_out, act_dtype)) * itemsize
    max_tn = max(128, (step_budget_bytes // per_lane) // 128 * 128)
    n_128 = _round_up(n, 128)
    tn = min(n_128, max_tn)
    steps_cap = (n_128 // min_steps) // 128 * 128   # tn <= n/min_steps, large n
    if steps_cap >= 128:
        tn = min(tn, steps_cap)
    return tn


def affine_blocks(x_blk, m, b, *, apply_sigmoid=True):
    """x_blk: (d_in, Nb) block-major activations.  m: (d_out, d_in) f32.
    b: (d_out, 1) f32.  Returns sigmoid(m @ x_blk + b) as (d_out, Nb)."""
    d_in, n = x_blk.shape
    d_out = m.shape[0]
    act_dtype = x_blk.dtype
    itemsize = jnp.dtype(act_dtype).itemsize

    tn = _choose_lane_tile(n, d_in, d_out, act_dtype)
    grid = (pl.cdiv(n, tn),)       # ragged final block masked by Pallas
                                   # (no per-layer jnp.pad / out slice)

    # VMEM: double-buffered activation tiles + resident matrix/bias + headroom.
    act_bytes = 2 * tn * (_sublane_pad(d_in, act_dtype)
                          + _sublane_pad(d_out, act_dtype)) * itemsize
    m_bytes = 2 * _round_up(d_out, 8) * _round_up(d_in, 128) * 4
    b_bytes = 2 * _round_up(d_out, 8) * 128 * 4
    vmem_need = act_bytes + m_bytes + b_bytes + (2 << 20)
    # Cap at 32 MiB so we keep headroom inside v7x's 64 MiB physical VMEM
    # (also fine on v5e/v6e); never starve a genuinely large-D config.
    vmem_limit = int(min(max(vmem_need, 16 << 20), 32 << 20))
    vmem_limit = max(vmem_limit, int(vmem_need))

    kernel = functools.partial(_affine_kernel, apply_sigmoid=apply_sigmoid)
    return pl.pallas_call(
        kernel,
        out_shape=jax.ShapeDtypeStruct((d_out, n), act_dtype),
        grid=grid,
        in_specs=[
            pl.BlockSpec((d_in, tn), lambda i: (0, i)),      # activation tile
            pl.BlockSpec((d_out, d_in), lambda i: (0, 0)),   # resident matrix
            pl.BlockSpec((d_out, 1), lambda i: (0, 0)),      # resident bias
        ],
        out_specs=pl.BlockSpec((d_out, tn), lambda i: (0, i)),
        compiler_params=pltpu.CompilerParams(
            dimension_semantics=("parallel",),
            vmem_limit_bytes=vmem_limit,
        ),
    )(x_blk, m, b)


# --------------------------- script parsing / init ---------------------------

COMMANDS = {'ch': re.compile(r'ch\s*([*/=])\s*(\d+)'),
            'down': re.compile(r'down(\d)')}


def build_layers(channels, script):
    script = '|'.join(filter(bool, (l.strip() for l in script.splitlines())))
    encoder, decoder = [], []
    ch = channels
    for line in script.split('|'):
        if '#' in line:
            line = line[:line.index('#')]
        line = line.strip()
        if not line:
            continue
        cmd, match = None, None
        for c, regex in COMMANDS.items():
            m = regex.match(line)
            if m:
                cmd, match = c, m
                break
        if match is None:
            raise SyntaxError(f'Could not parse line `{line}`')
        if cmd == 'ch':
            op, val = match.groups()
            if op == '=':
                new_ch = int(val)
            elif op == '*':
                new_ch = ch * int(val)
            else:
                new_ch = int(ch / int(val))
            encoder.append(('resconv', ch, new_ch))
            # transposed 1x1 conv is also a plain per-pixel channel matmul
            decoder.insert(0, ('resconv', new_ch, ch))
            ch = new_ch
        elif cmd == 'down':
            encoder.append(('unshuffle',))
            decoder.insert(0, ('shuffle',))
            ch = ch * 4
    return encoder, decoder


def init_params(layers, key, scale=0.1):
    """Raw (unfolded) weights: w (c_out, c_in), b (c_out, 1)."""
    params = []
    for i, layer in enumerate(layers):
        if layer[0] == 'resconv':
            _, c_in, c_out = layer
            kw, kb = jax.random.split(jax.random.fold_in(key, i))
            w = scale * jax.random.normal(kw, (c_out, c_in), jnp.float32)
            b = scale * jax.random.normal(kb, (c_out, 1), jnp.float32)
            params.append((w, b))
        else:
            params.append(None)
    return params


# ----------------- whole-network affine composition (setup) ------------------

def _residual_matrix(c_in, c_out):
    """0/1 matrix R (c_out, c_in) with R @ x == the 'add'-mode residual channel
    tiling/folding (mirrors the PyTorch while loops).  When c_in == c_out
    neither branch executes, so R == 0 — matching the module."""
    R = np.zeros((c_out, c_in), np.float64)
    if c_in < c_out:
        idx = 0
        while idx < c_out:
            size = min(c_in, c_out - idx)
            R[idx:idx + size, :size] += np.eye(size)
            idx += c_in
    elif c_in > c_out:
        idx = 0
        while idx < c_in:
            size = min(c_out, c_in - idx)
            R[:size, idx:idx + size] += np.eye(size)
            idx += c_out
    return R


def _unshuffle_perm(ch, s):
    """PixelUnshuffle(2) on block coords: old state (c, i, j), i,j in [s] ->
    new (c*4 + dy*2 + dx, i', j'), i',j' in [s//2], where i=2i'+dy, j=2j'+dx."""
    s2 = s // 2
    P = np.zeros((ch * 4 * s2 * s2, ch * s * s), np.float64)
    old = lambda c, i, j: (c * s + i) * s + j
    new = lambda c, i, j: (c * s2 + i) * s2 + j
    for c in range(ch):
        for dy in range(2):
            for dx in range(2):
                for i in range(s2):
                    for j in range(s2):
                        P[new(c * 4 + dy * 2 + dx, i, j),
                          old(c, 2 * i + dy, 2 * j + dx)] = 1.0
    return P


def _shuffle_perm(ch4, s):
    """PixelShuffle(2) on block coords: new (c, i, j), i,j in [2s] reads
    old (c*4 + (i%2)*2 + (j%2), i//2, j//2)."""
    ch, s2 = ch4 // 4, s * 2
    P = np.zeros((ch * s2 * s2, ch4 * s * s), np.float64)
    old = lambda c, i, j: (c * s + i) * s + j
    new = lambda c, i, j: (c * s2 + i) * s2 + j
    for c in range(ch):
        for i in range(s2):
            for j in range(s2):
                P[new(c, i, j),
                  old(c * 4 + (i % 2) * 2 + (j % 2), i // 2, j // 2)] = 1.0
    return P


def build_plan(channels, enc_layers, enc_params, dec_layers, dec_params):
    """Compose the whole encoder+decoder (all affine in the default config)
    into a single per-RxR-block map out = M @ in + bias (Sigmoid applied in
    the kernel).  Composition is float64, stored f32: weights stay full
    precision (folding the +1 residual in bf16 would drop mantissa bits)."""
    n_down = sum(1 for l in enc_layers if l[0] == 'unshuffle')
    R = 2 ** n_down
    d0 = channels * R * R
    M = np.eye(d0, dtype=np.float64)
    bias = np.zeros((d0,), np.float64)
    s, ch = R, channels                         # subpixel grid side, channels
    layers = list(enc_layers) + list(dec_layers)
    params = list(enc_params) + list(dec_params)
    for layer, p in zip(layers, params):
        if layer[0] == 'resconv':
            _, c_in, c_out = layer
            w = np.asarray(p[0], np.float64) + _residual_matrix(c_in, c_out)
            b = np.asarray(p[1], np.float64).reshape(-1)
            A = np.kron(w, np.eye(s * s))       # per-pixel channel map
            v = np.repeat(b, s * s)
            M = A @ M
            bias = A @ bias + v
            ch = c_out
        elif layer[0] == 'unshuffle':
            P = _unshuffle_perm(ch, s)
            M = P @ M
            bias = P @ bias
            ch, s = ch * 4, s // 2
        else:                                   # shuffle
            P = _shuffle_perm(ch, s)
            M = P @ M
            bias = P @ bias
            ch, s = ch // 4, s * 2
    assert M.shape == (d0, d0) and ch == channels and s == R
    return {
        'R': R,
        'D': d0,
        'M': jnp.asarray(M, jnp.float32),
        'bias': jnp.asarray(bias.reshape(d0, 1), jnp.float32),
    }


# -------------------------------- forward pass --------------------------------

def forward(x_nchw, plan, act_dtype=jnp.bfloat16):
    """Full ResidualScriptedAE forward.  bf16 activations by default (the
    kernel is HBM-bound); composed matrix/bias + accumulation stay f32."""
    B, C, H, W = x_nchw.shape
    R, D = plan['R'], plan['D']
    assert H % R == 0 and W % R == 0, 'spatial dims must be divisible by 2^#down'
    Hc, Wc = H // R, W // R
    nb = B * Hc * Wc
    # Single layout conversion at the module boundary (fused with the cast):
    # NCHW -> block-major (D, Nb) with pixel blocks on the 128-lane axis.
    xb = x_nchw.reshape(B, C, Hc, R, Wc, R)
    xb = jnp.transpose(xb, (1, 3, 5, 0, 2, 4)).reshape(D, nb).astype(act_dtype)
    yb = affine_blocks(xb, plan['M'], plan['bias'], apply_sigmoid=True)
    y = yb.reshape(C, R, R, B, Hc, Wc)
    y = jnp.transpose(y, (3, 0, 4, 1, 5, 2)).reshape(B, C, H, W)
    return y.astype(jnp.float32)


# --------------------- plain-JAX reference (PyTorch semantics) ----------------

def _ref_forward(x, enc_layers, enc_params, dec_layers, dec_params):
    def resconv(x, w, b, c_in, c_out):
        y = jnp.einsum('oi,bihw->bohw', w, x,
                       precision=jax.lax.Precision.HIGHEST)
        y = y + b.reshape(1, c_out, 1, 1)
        if c_in < c_out:
            idx = 0
            while idx < c_out:
                size = min(c_in, c_out - idx)
                y = y.at[:, idx:idx + size].add(x[:, :size])
                idx += c_in
        elif c_in > c_out:
            idx = 0
            while idx < c_in:
                size = min(c_out, c_in - idx)
                y = y.at[:, :size].add(x[:, idx:idx + size])
                idx += c_out
        return y

    def unshuffle(x, r=2):
        B, C, H, W = x.shape
        x = x.reshape(B, C, H // r, r, W // r, r)
        return jnp.transpose(x, (0, 1, 3, 5, 2, 4)).reshape(
            B, C * r * r, H // r, W // r)

    def shuffle(x, r=2):
        B, C4, H, W = x.shape
        C = C4 // (r * r)
        x = x.reshape(B, C, r, r, H, W)
        return jnp.transpose(x, (0, 1, 4, 2, 5, 3)).reshape(B, C, H * r, W * r)

    def seq(x, layers, params):
        for layer, p in zip(layers, params):
            if layer[0] == 'resconv':
                _, ci, co = layer
                x = resconv(x, p[0], p[1], ci, co)
            elif layer[0] == 'unshuffle':
                x = unshuffle(x)
            else:
                x = shuffle(x)
        return x

    z = seq(x, enc_layers, enc_params)
    return jax.nn.sigmoid(seq(z, dec_layers, dec_params))


# ----------------------------------- main --------------------------------------

if __name__ == "__main__":
    key = jax.random.PRNGKey(0)
    B, C, H, W = 2, 4, 16, 16
    script = """
    ch*2
    down2
    ch/2
    """
    enc_layers, dec_layers = build_layers(C, script)
    k_enc, k_dec, k_x = jax.random.split(key, 3)
    enc_raw = init_params(enc_layers, k_enc)
    dec_raw = init_params(dec_layers, k_dec)
    plan = build_plan(C, enc_layers, enc_raw, dec_layers, dec_raw)

    x = jax.random.uniform(k_x, (B, C, H, W), dtype=jnp.float32)

    fwd_bf16 = jax.jit(functools.partial(forward, plan=plan,
                                         act_dtype=jnp.bfloat16))
    fwd_f32 = jax.jit(functools.partial(forward, plan=plan,
                                        act_dtype=jnp.float32))

    out = fwd_bf16(x)
    jax.block_until_ready(out)
    assert out.shape == (B, C, H, W), out.shape
    assert bool(jnp.all(jnp.isfinite(out)))

    # Correctness vs. plain-JAX layered reference (explicit unfolded residual).
    ref = _ref_forward(x, enc_layers, enc_raw, dec_layers, dec_raw)

    # f32-activation path must match tightly.
    out_f32 = fwd_f32(x)
    jax.block_until_ready(out_f32)
    err_f32 = float(jnp.max(jnp.abs(out_f32 - ref)))
    assert err_f32 < 1e-3, f"f32 path mismatch vs reference: {err_f32}"

    # bf16-activation path: error dominated by bf16 quantisation of the
    # input/output slabs (~2^-9 relative), comfortably under 3e-2 post-sigmoid.
    err_bf16 = float(jnp.max(jnp.abs(out.astype(jnp.float32) - ref)))
    assert err_bf16 < 3e-2, f"bf16 path mismatch vs reference: {err_bf16}"

    print("KERNEL_OK")
</pallas_src>

<mosaic_0001>
module attributes {stable_mosaic.version = 11 : i64} {
  func.func @_affine_kernel(%arg0: i32, %arg1: memref<16x128xbf16, #tpu.memory_space<vmem>>, %arg2: memref<16x16xf32, #tpu.memory_space<vmem>>, %arg3: memref<16x1xf32, #tpu.memory_space<vmem>>, %arg4: memref<16x128xbf16, #tpu.memory_space<vmem>>) attributes {dimension_semantics = [#tpu.dimension_semantics<parallel>], iteration_bounds = array<i64: 1>, scalar_prefetch = 0 : i64, scratch_operands = 0 : i64, tpu.core_type = #tpu.core_type<tc>, window_params = [{transform_indices = @transform_0, window_bounds = array<i64: 16, 128>}, {pipeline_mode = #tpu.pipeline_mode<synchronous>, transform_indices = @transform_1, window_bounds = array<i64: 16, 16>}, {pipeline_mode = #tpu.pipeline_mode<synchronous>, transform_indices = @transform_2, window_bounds = array<i64: 16, 1>}, {transform_indices = @transform_3, window_bounds = array<i64: 16, 128>}]} {
    %c0 = arith.constant 0 : index
    %c0_0 = arith.constant 0 : index
    %0 = vector.load %arg1[%c0, %c0_0] : memref<16x128xbf16, #tpu.memory_space<vmem>>, vector<16x128xbf16>
    %1 = arith.extf %0 : vector<16x128xbf16> to vector<16x128xf32>
    %c0_1 = arith.constant 0 : index
    %c0_2 = arith.constant 0 : index
    %2 = vector.load %arg2[%c0_1, %c0_2] : memref<16x16xf32, #tpu.memory_space<vmem>>, vector<16x16xf32>
    %cst = arith.constant dense<0.000000e+00> : vector<16x128xf32>
    %3 = tpu.matmul %2, %1, %cst {dimension_numbers = #tpu.dot_dimension_numbers<[1], [0], [0], [1], [0, 0, 1, 1], [], []>} : vector<16x16xf32>, vector<16x128xf32>, vector<16x128xf32> -> vector<16x128xf32>
    %c0_3 = arith.constant 0 : index
    %c0_4 = arith.constant 0 : index
    %4 = vector.load %arg3[%c0_3, %c0_4] : memref<16x1xf32, #tpu.memory_space<vmem>>, vector<16x1xf32>
    %5 = vector.broadcast %4 : vector<16x1xf32> to vector<16x128xf32>
    %6 = arith.addf %3, %5 : vector<16x128xf32>
    %7 = arith.negf %6 : vector<16x128xf32>
    %8 = math.exp %7 : vector<16x128xf32>
    %cst_5 = arith.constant 1.000000e+00 : f32
    %9 = vector.broadcast %cst_5 : f32 to vector<16x128xf32>
    %10 = arith.addf %9, %8 : vector<16x128xf32>
    %11 = arith.divf %9, %10 : vector<16x128xf32>
    %12 = arith.truncf %11 : vector<16x128xf32> to vector<16x128xbf16>
    %c0_6 = arith.constant 0 : index
    %c0_7 = arith.constant 0 : index
    %13 = vector.load %arg4[%c0_6, %c0_7] : memref<16x128xbf16, #tpu.memory_space<vmem>>, vector<16x128xbf16>
    tpu.vector_store %arg4[%c0_6, %c0_7], %12 {strides = array<i32>} : memref<16x128xbf16, #tpu.memory_space<vmem>>, vector<16x128xbf16>,
    return
  }
  func.func @transform_0(%arg0: i32) -> (i32, i32) {
    %c0_i32 = arith.constant 0 : i32
    %c0_i32_0 = arith.constant 0 : i32
    return %c0_i32, %arg0 : i32, i32
  }
  func.func @transform_1(%arg0: i32) -> (i32, i32) {
    %c0_i32 = arith.constant 0 : i32
    %c0_i32_0 = arith.constant 0 : i32
    %c0_i32_1 = arith.constant 0 : i32
    return %c0_i32, %c0_i32_0 : i32, i32
  }
  func.func @transform_2(%arg0: i32) -> (i32, i32) {
    %c0_i32 = arith.constant 0 : i32
    %c0_i32_0 = arith.constant 0 : i32
    %c0_i32_1 = arith.constant 0 : i32
    return %c0_i32, %c0_i32_0 : i32, i32
  }
  func.func @transform_3(%arg0: i32) -> (i32, i32) {
    %c0_i32 = arith.constant 0 : i32
    %c0_i32_0 = arith.constant 0 : i32
    return %c0_i32, %arg0 : i32, i32
  }
}

</mosaic_0001>

<bundles_post_ra>
// kernel: forward.1
= control target key start
LH: loop header
LB: loop body
LE: loop exit
PB: predicated region body
PF: predicated region fallthrough
CT: control target
= control target key end

     0   :  { %vm32_vm0 = vcmask 130048   ;;  %v182_v2 = vmov 0   ;;  %s221_s0 = inlined_call_operand.vmem [shape: bf16[16,128], index: 0, kind: input, shape index: {}]   ;;  %s222_s1 = inlined_call_operand.vmem [shape: f32[16,16], index: 1, kind: input, shape index: {}]   ;;  %s223_s2 = inlined_call_operand.vmem [shape: f32[16,1], index: 2, kind: input, shape index: {}]   ;;  %s224_s3 = inlined_call_operand.vmem [shape: bf16[16,128], index: 3, kind: output, shape index: {}]  }
   0x1   :  { %v149_v0 = vld [vmem:[%s221_s0] sm:$0xff]   ;;  %173 = vset.pattern.permute.xlu0 %v182_v2  ;;  %v19_v4 = vld [vmem:[%s222_s1 + $0x8] sm:$0xff] }
   0x2   :  { %v18_v1 = vld [vmem:[%s222_s1] sm:$0xff]  ;;  %169 = vmatprep.subr.bf16.mxu0 %v149_v0  ;;  %v21_v5 = vld [vmem:[%s223_s2 + $0x8] sm:$0xff] }
   0x3   :  { %165 = vmatprep.mubr.msk.f32.mxu0 %vm32_vm0, %v18_v1  ;;  %v20_v3 = vld [vmem:[%s223_s2] sm:$0xff]  ;;  %171 = vmatpush3.bf16.msra.mxu0 %v149_v0 }
   0x4   :  { %24 = vperm.xlu0 %173, %v20_v3  }
   0x6   :  { %166 = vmatmul.mubr.msk.f32.vlgmr.msra.gmra.mrb[0].mxu0 %vm32_vm0, %v19_v4 }
   0x8   :  { %29 = vperm.xlu0 %173, %v21_v5  }
  0x83   :  { %v25_v6 = vpop.permute.xlu0 %24 }
  0x87   :  { %v30_v7 = vpop.permute.xlu0 %29 }
  0xd9   :  { %v167_v8 = vpop.f32.mrb[0].mxu0 }
  0xda   :  { %v111_v9 = vadd.f32 %v167_v8, %v30_v7  ;;  %v105_v10 = vpop.f32.mrb[1].mxu0 }
  0xdb   :  { %v106_v11 = vadd.f32 %v105_v10, %v25_v6 }
  0xdc   :  { %v143_v12 = vmul.f32 -1.442695, %v111_v9 }
  0xdd   :  { %v142_v13 = vmul.f32 -1.442695, %v106_v11 }
  0xde   :  { %174 = vpow2.f32 %v143_v12 }
  0xdf   :  { %176 = vpow2.f32 %v142_v13 }
  0xe8   :  { %v175_v14 = vpop.eup %174 }
  0xe9   :  { %v177_v15 = vpop.eup %176  ;;  %v121_v16 = vadd.f32 1.0, %v175_v14 }
  0xea   :  { %v120_v17 = vadd.f32 1.0, %v177_v15 }
  0xeb   :  { %178 = vrcp.f32 %v121_v16 }
  0xec   :  { %180 = vrcp.f32 %v120_v17 }
  0xf5   :  { %v179_v18 = vpop.eup %178 }
  0xf6   :  { %v181_v19 = vpop.eup %180 }
  0xf7   :  { %v155_v20 = vpack.c.bf16 %v179_v18, %v181_v19 }
  0xf9   :  { %156 = vst [vmem:[%s224_s3] sm:$0xff] %v155_v20  }

</bundles_post_ra>
